<compile_context>
chip_gen: v5e
topology: v5e:2x2
jax: 0.10.0
libtpu: 0.0.40
codegen_flags: <defaults>
</compile_context>

<pallas_src>
import math
from functools import partial

import jax
import jax.numpy as jnp
from jax import lax
from jax.experimental import pallas as pl
from jax.experimental.pallas import tpu as pltpu


# ----------------------------------------------------------------------------
# Generation-aware VMEM budgets
# ----------------------------------------------------------------------------
def _vmem_capacity_bytes():
    try:
        return int(pltpu.get_tpu_info().vmem_capacity_bytes)
    except Exception:
        return 64 * 1024 * 1024  # conservative fallback: fits v5e/v6e/v7x


_VMEM_CAP = _vmem_capacity_bytes()
_VMEM_LIMIT = min(int(_VMEM_CAP * 0.82), 112 * 1024 * 1024)   # ~105 MiB on 128 MiB parts, ~52 MiB on v7x
_TILE_BUDGET = int(_VMEM_LIMIT * 0.8)


def _compiler_params():
    return pltpu.CompilerParams(dimension_semantics=("parallel",),
                                vmem_limit_bytes=_VMEM_LIMIT)


def _pick_node_tile(n, d_in, k_rows, budget_bytes):
    """Node tile for the projection kernel (lane dim -> multiple of 128 or N)."""
    if n % 128 != 0 or n < 256:
        return n
    for t in (4096, 2048, 1024, 512, 256, 128):
        if n % t != 0 or n // t < 2:        # prefer >=2 steps (v7x megacore)
            continue
        step_bytes = t * (8 * d_in + 6 * k_rows + 96) + 4 * k_rows * d_in
        if step_bytes <= budget_bytes:
            return t
    return 128


def _pick_dst_tile(n_nodes, n_heads, d_model, resident_bytes, budget_bytes):
    """Destination tile for the attention kernel (lane-dense output stores)."""
    if n_nodes % 128 != 0 or n_nodes < 256:
        return n_nodes                       # untiled fallback, still correct
    # Approx. bytes per destination column: adj(int8 x2) + c scratch(bf16) +
    # ~3 live f32 score temps (one head at a time) + res/out/einsum result + er.
    per_col = n_nodes * (2 * n_heads + 14) + 24 * d_model + 64
    cands = [t for t in (1024, 512, 256, 128)
             if n_nodes % t == 0 and n_nodes // t >= 2]
    if not cands:
        return n_nodes
    for t in cands:
        if resident_bytes + t * per_col <= budget_bytes:
            return t
    return cands[-1]


# ----------------------------------------------------------------------------
# Kernel 1: fused fc / attn_l / attn_r projection (lane-dense over nodes)
#   proj = [W | W@attn_l | W@attn_r]^T @ h^T, emitted as ft^T / el / er^T.
# ----------------------------------------------------------------------------
def _qagat_project_kernel(w_ref, h_ref, ftt_ref, el_ref, ert_ref, *,
                          num_heads, out_feats):
    H, F = num_heads, out_feats
    HF = H * F
    proj = jnp.dot(w_ref[...], h_ref[...].astype(jnp.bfloat16),
                   preferred_element_type=jnp.float32)          # (K, tn) f32
    tn = proj.shape[1]
    ftt_ref[...] = proj[:HF, :].astype(jnp.bfloat16).reshape(H, F, tn)
    el_ref[...] = proj[HF:HF + H, :].reshape(H, 1, tn)
    ert_ref[...] = jnp.transpose(proj[HF + H:, :])              # (tn, H)


def _project(ht, w_cat_t, *, num_heads, out_feats):
    K, D = w_cat_t.shape
    _, N = ht.shape
    H, F = num_heads, out_feats
    tn = _pick_node_tile(N, D, K, _TILE_BUDGET)
    kern = partial(_qagat_project_kernel, num_heads=H, out_feats=F)
    return pl.pallas_call(
        kern,
        out_shape=(jax.ShapeDtypeStruct((H, F, N), jnp.bfloat16),   # ft^T
                   jax.ShapeDtypeStruct((H, 1, N), jnp.float32),    # el (src term)
                   jax.ShapeDtypeStruct((N, H), jnp.float32)),      # er^T (dst term)
        grid=(N // tn,),
        in_specs=[pl.BlockSpec((K, D), lambda i: (0, 0)),
                  pl.BlockSpec((D, tn), lambda i: (0, i))],
        out_specs=(pl.BlockSpec((H, F, tn), lambda i: (0, 0, i)),
                   pl.BlockSpec((H, 1, tn), lambda i: (0, 0, i)),
                   pl.BlockSpec((tn, H), lambda i: (i, 0))),
        compiler_params=_compiler_params(),
    )(w_cat_t, ht)


# ----------------------------------------------------------------------------
# Kernel 2: GAT attention + PageRank re-weighting + aggregation (+ ELU/mean,
#           bias, residual).  One destination-node tile per grid step.
#           Per-head streamed score math, single batched-over-heads MXU einsum.
# ----------------------------------------------------------------------------
def _qagat_attn_kernel(ftt_ref, el_ref, ert_ref, pr_ref, adj_ref, res_ref,
                       bias_ref, out_ref, c_ref, *, num_heads, out_feats,
                       neg_slope, last_layer):
    H, F = num_heads, out_feats
    Td, N = adj_ref.shape

    adj_ok = adj_ref[...] > 0                         # (Td, N)  int8 mask
    pr = pr_ref[...]                                  # (1, N)   PageRank (src)
    er_tile = ert_ref[...]                            # (Td, H)  dst term, lane-dense
    head_ids = lax.broadcasted_iota(jnp.int32, (1, H), 1)

    def head_body(h, carry):
        el_h = el_ref[h]                              # (1, N)   leading-dim dyn index
        # one-hot lane select of head h's column -> (Td, 1); avoids dyn lane slices
        er_h = jnp.sum(jnp.where(head_ids == h, er_tile, 0.0),
                       axis=1, keepdims=True)
        s = el_h + er_h                               # (Td, N)
        s = jnp.maximum(s, neg_slope * s)             # LeakyReLU (single VPU op)
        s = jnp.where(adj_ok, s, -1e30)               # single mask pass
        # Fused edge_softmax * PageRank re-weighting * renormalization:
        #   c = (exp(e - max) * pr) / sum_src(exp(e - max) * pr)
        m = jnp.max(s, axis=-1, keepdims=True)        # (Td, 1)
        p = jnp.exp(s - m) * pr                       # non-edges underflow to 0
        denom = jnp.sum(p, axis=-1, keepdims=True)    # > 0 given self-loops
        c = p * pl.reciprocal(jnp.maximum(denom, 1e-30), approx=True)
        c_ref[h] = c.astype(c_ref.dtype)              # bf16 coefficients
        return carry

    lax.fori_loop(0, H, head_body, 0)

    # Batched head aggregation on the MXU: (H, F, N) x (H, Td, N) -> (H, F, Td)
    rst = jnp.einsum("hfn,htn->hft", ftt_ref[...], c_ref[...],
                     preferred_element_type=jnp.float32)

    if last_layer:
        # QAGAT: h = prev_h + mean_heads(rst + bias)
        out_ref[...] = res_ref[...] + jnp.mean(rst, axis=0) + bias_ref[...]
    else:
        # QAGAT: h = prev_h + elu(concat_heads(rst + bias))
        r = rst.reshape(H * F, Td) + bias_ref[...]
        elu = jnp.where(r > 0.0, r, jnp.exp(jnp.minimum(r, 0.0)) - 1.0)
        out_ref[...] = res_ref[...] + elu


def qagat_conv_t(ht, adj_i8, pr, params, *, num_heads, out_feats,
                 neg_slope=0.2, last_layer=False):
    """One QAGATConv layer (+ QAGAT elu/mean + residual), feature-major layout.

    ht : (d_model, N) f32, adj_i8 : (N, N) int8, pr : (1, N) f32 -> (d_model, N) f32
    """
    D, N = ht.shape
    H, F = num_heads, out_feats
    HF = H * F

    # Fused fc + attn_l + attn_r projection (single lane-dense bf16 MXU pass);
    # the kernel itself writes ft^T / el / er^T (no wrapper slicing of proj_t).
    ftt, el, ert = _project(ht, params["w_cat_t"], num_heads=H, out_feats=F)

    if last_layer:
        bias_col = jnp.mean(params["bias"].reshape(H, F), axis=0).reshape(F, 1)
    else:
        bias_col = params["bias"].reshape(HF, 1)

    # resident inputs (double-buffered): ft^T bf16, el (sublane-padded), pr, bias
    resident = 2 * (HF * N * 2 + H * 8 * N * 4 + N * 4 + D * 512)
    td = _pick_dst_tile(N, H, D, resident, _TILE_BUDGET)

    kernel = partial(_qagat_attn_kernel, num_heads=H, out_feats=F,
                     neg_slope=neg_slope, last_layer=last_layer)

    return pl.pallas_call(
        kernel,
        out_shape=jax.ShapeDtypeStruct((D, N), jnp.float32),
        grid=(N // td,),
        in_specs=[
            pl.BlockSpec((H, F, N), lambda i: (0, 0, 0)),   # ft^T   (resident, bf16)
            pl.BlockSpec((H, 1, N), lambda i: (0, 0, 0)),   # el     (resident)
            pl.BlockSpec((td, H), lambda i: (i, 0)),        # er^T   (dst tile)
            pl.BlockSpec((1, N), lambda i: (0, 0)),         # pr     (resident)
            pl.BlockSpec((td, N), lambda i: (i, 0)),        # adj    (dst tile, int8)
            pl.BlockSpec((D, td), lambda i: (0, i)),        # residual (dst tile)
            pl.BlockSpec((D, 1), lambda i: (0, 0)),         # bias column
        ],
        out_specs=pl.BlockSpec((D, td), lambda i: (0, i)),
        scratch_shapes=[pltpu.VMEM((H, td, N), jnp.bfloat16)],  # attention coeffs
        compiler_params=_compiler_params(),
    )(ftt, el, ert, pr, adj_i8, ht, bias_col)


# ----------------------------------------------------------------------------
# Parameter initialization (mirrors QAGATConv.__init__ / reset_parameters)
# ----------------------------------------------------------------------------
def init_qagatconv_params(key, in_feats, out_feats, num_heads):
    kw, kl, kr = jax.random.split(key, 3)
    gain = math.sqrt(2.0)  # calculate_gain('relu')

    # fc.weight: torch (H*F, in) xavier_normal; stored transposed for feat @ W
    std_w = gain * math.sqrt(2.0 / (in_feats + out_feats * num_heads))
    w = std_w * jax.random.normal(kw, (in_feats, out_feats * num_heads),
                                  jnp.float32)

    # attn_l / attn_r: torch shape (1, H, F), xavier_normal
    std_a = gain * math.sqrt(2.0 / (num_heads * out_feats + out_feats))
    attn_l = std_a * jax.random.normal(kl, (num_heads, out_feats), jnp.float32)
    attn_r = std_a * jax.random.normal(kr, (num_heads, out_feats), jnp.float32)

    # Fold the attention projections into the fc weight:
    #   el = feat @ wl   with wl[d, h] = sum_f w[d, h*F + f] * attn_l[h, f]
    w_heads = w.reshape(in_feats, num_heads, out_feats)
    wl = jnp.einsum("dhf,hf->dh", w_heads, attn_l)
    wr = jnp.einsum("dhf,hf->dh", w_heads, attn_r)
    # One fused weight, transposed and bf16 so proj = w_cat_t @ h^T feeds the MXU
    # directly and is lane-dense over nodes.
    w_cat_t = jnp.concatenate([w, wl, wr], axis=1).T.astype(jnp.bfloat16)

    bias = jnp.zeros((num_heads * out_feats,), jnp.float32)
    return dict(w_cat_t=w_cat_t, bias=bias)


# ----------------------------------------------------------------------------
# QAGAT forward: (n_gnn - 1) residual GAT layers + final mean-over-heads layer
# ----------------------------------------------------------------------------
def qagat_forward(feat, adj, pr, layer_params, last_params, num_heads=8):
    d_model = feat.shape[1]
    head_outdim = d_model // num_heads

    ht = jnp.transpose(feat)                 # feature-major (D, N) layout
    adj_i8 = (adj > 0).astype(jnp.int8)      # mask-only usage -> narrowest dtype

    for p in layer_params:
        ht = qagat_conv_t(ht, adj_i8, pr, p, num_heads=num_heads,
                          out_feats=head_outdim, last_layer=False)
    ht = qagat_conv_t(ht, adj_i8, pr, last_params, num_heads=num_heads,
                      out_feats=d_model, last_layer=True)
    return jnp.transpose(ht)                 # back to node-major (N, D)


# ----------------------------------------------------------------------------
if __name__ == "__main__":
    key = jax.random.PRNGKey(0)
    N, d_model, n_gnn, num_heads = 8, 32, 3, 8

    k_feat, k_adj, k_pr, k_params = jax.random.split(key, 4)

    # node features (g.ndata['feat'])
    feat = jax.random.normal(k_feat, (N, d_model), jnp.float32)

    # dense adjacency with self-loops: adj[v, u] = 1 iff edge u -> v
    adj = (jax.random.uniform(k_adj, (N, N)) < 0.4).astype(jnp.float32)
    adj = jnp.maximum(adj, jnp.eye(N, dtype=jnp.float32))

    # PageRank scores (g.ndata['pr_score']), positive
    pr = jax.random.uniform(k_pr, (1, N), minval=0.1, maxval=1.0,
                            dtype=jnp.float32)

    # parameters: (n_gnn - 1) intermediate layers + last layer
    keys = jax.random.split(k_params, n_gnn)
    layer_params = [
        init_qagatconv_params(keys[i], d_model, d_model // num_heads, num_heads)
        for i in range(n_gnn - 1)
    ]
    last_params = init_qagatconv_params(keys[-1], d_model, d_model, num_heads)

    out = qagat_forward(feat, adj, pr, layer_params, last_params,
                        num_heads=num_heads)
    out = jax.block_until_ready(out)
    assert out.shape == (N, d_model) and bool(jnp.all(jnp.isfinite(out)))
    print("KERNEL_OK")
</pallas_src>

<mosaic_0001>
module attributes {stable_mosaic.version = 11 : i64} {
  func.func @_qagat_project_kernel(%arg0: i32, %arg1: memref<48x32xbf16, #tpu.memory_space<vmem>>, %arg2: memref<32x8xf32, #tpu.memory_space<vmem>>, %arg3: memref<8x4x8xbf16, #tpu.memory_space<vmem>>, %arg4: memref<8x1x8xf32, #tpu.memory_space<vmem>>, %arg5: memref<8x8xf32, #tpu.memory_space<vmem>>) attributes {dimension_semantics = [#tpu.dimension_semantics<parallel>], iteration_bounds = array<i64: 1>, scalar_prefetch = 0 : i64, scratch_operands = 0 : i64, tpu.core_type = #tpu.core_type<tc>, window_params = [{pipeline_mode = #tpu.pipeline_mode<synchronous>, transform_indices = @transform_0, window_bounds = array<i64: 48, 32>}, {transform_indices = @transform_1, window_bounds = array<i64: 32, 8>}, {transform_indices = @transform_2, window_bounds = array<i64: 8, 4, 8>}, {transform_indices = @transform_3, window_bounds = array<i64: 8, 1, 8>}, {transform_indices = @transform_4, window_bounds = array<i64: 8, 8>}]} {
    %c0 = arith.constant 0 : index
    %c0_0 = arith.constant 0 : index
    %0 = vector.load %arg1[%c0, %c0_0] : memref<48x32xbf16, #tpu.memory_space<vmem>>, vector<48x32xbf16>
    %c0_1 = arith.constant 0 : index
    %c0_2 = arith.constant 0 : index
    %1 = vector.load %arg2[%c0_1, %c0_2] : memref<32x8xf32, #tpu.memory_space<vmem>>, vector<32x8xf32>
    %2 = arith.truncf %1 : vector<32x8xf32> to vector<32x8xbf16>
    %cst = arith.constant dense<0.000000e+00> : vector<48x8xf32>
    %3 = tpu.matmul %0, %2, %cst {dimension_numbers = #tpu.dot_dimension_numbers<[1], [0], [0], [1], [0, 0, 1, 1], [], []>} : vector<48x32xbf16>, vector<32x8xbf16>, vector<48x8xf32> -> vector<48x8xf32>
    %4 = vector.extract_strided_slice %3 {offsets = [0, 0], sizes = [32, 8], strides = [1, 1]} : vector<48x8xf32> to vector<32x8xf32>
    %5 = arith.truncf %4 : vector<32x8xf32> to vector<32x8xbf16>
    %6 = vector.shape_cast %5 : vector<32x8xbf16> to vector<8x4x8xbf16>
    %c0_3 = arith.constant 0 : index
    %c0_4 = arith.constant 0 : index
    %c0_5 = arith.constant 0 : index
    %7 = vector.load %arg3[%c0_3, %c0_4, %c0_5] : memref<8x4x8xbf16, #tpu.memory_space<vmem>>, vector<8x4x8xbf16>
    tpu.vector_store %arg3[%c0_3, %c0_4, %c0_5], %6 {strides = array<i32>} : memref<8x4x8xbf16, #tpu.memory_space<vmem>>, vector<8x4x8xbf16>,
    %8 = vector.extract_strided_slice %3 {offsets = [32, 0], sizes = [8, 8], strides = [1, 1]} : vector<48x8xf32> to vector<8x8xf32>
    %9 = vector.shape_cast %8 : vector<8x8xf32> to vector<8x1x8xf32>
    %c0_6 = arith.constant 0 : index
    %c0_7 = arith.constant 0 : index
    %c0_8 = arith.constant 0 : index
    %10 = vector.load %arg4[%c0_6, %c0_7, %c0_8] : memref<8x1x8xf32, #tpu.memory_space<vmem>>, vector<8x1x8xf32>
    tpu.vector_store %arg4[%c0_6, %c0_7, %c0_8], %9 {strides = array<i32>} : memref<8x1x8xf32, #tpu.memory_space<vmem>>, vector<8x1x8xf32>,
    %11 = vector.extract_strided_slice %3 {offsets = [40, 0], sizes = [8, 8], strides = [1, 1]} : vector<48x8xf32> to vector<8x8xf32>
    %12 = tpu.transpose %11, [1, 0] : vector<8x8xf32> -> vector<8x8xf32>
    %c0_9 = arith.constant 0 : index
    %c0_10 = arith.constant 0 : index
    %13 = vector.load %arg5[%c0_9, %c0_10] : memref<8x8xf32, #tpu.memory_space<vmem>>, vector<8x8xf32>
    tpu.vector_store %arg5[%c0_9, %c0_10], %12 {strides = array<i32>} : memref<8x8xf32, #tpu.memory_space<vmem>>, vector<8x8xf32>,
    return
  }
  func.func @transform_0(%arg0: i32) -> (i32, i32) {
    %c0_i32 = arith.constant 0 : i32
    %c0_i32_0 = arith.constant 0 : i32
    %c0_i32_1 = arith.constant 0 : i32
    return %c0_i32, %c0_i32_0 : i32, i32
  }
  func.func @transform_1(%arg0: i32) -> (i32, i32) {
    %c0_i32 = arith.constant 0 : i32
    %c0_i32_0 = arith.constant 0 : i32
    return %c0_i32, %arg0 : i32, i32
  }
  func.func @transform_2(%arg0: i32) -> (i32, i32, i32) {
    %c0_i32 = arith.constant 0 : i32
    %c0_i32_0 = arith.constant 0 : i32
    %c0_i32_1 = arith.constant 0 : i32
    return %c0_i32, %c0_i32_0, %arg0 : i32, i32, i32
  }
  func.func @transform_3(%arg0: i32) -> (i32, i32, i32) {
    %c0_i32 = arith.constant 0 : i32
    %c0_i32_0 = arith.constant 0 : i32
    %c0_i32_1 = arith.constant 0 : i32
    return %c0_i32, %c0_i32_0, %arg0 : i32, i32, i32
  }
  func.func @transform_4(%arg0: i32) -> (i32, i32) {
    %c0_i32 = arith.constant 0 : i32
    %c0_i32_0 = arith.constant 0 : i32
    return %arg0, %c0_i32 : i32, i32
  }
}

</mosaic_0001>

<bundles_post_ra>
// kernel: tpu_custom_call.1
= control target key start
LH: loop header
LB: loop body
LE: loop exit
PB: predicated region body
PF: predicated region fallthrough
CT: control target
= control target key end

     0   :  { %10 = vsyncpa [#allocation3], 0  ;;  %s434_s0 = inlined_call_operand.vmem [shape: bf16[48,32], index: 0, kind: input, shape index: {}]   ;;  %s435_s1 = inlined_call_operand.vmem [shape: f32[32,8], index: 1, kind: input, shape index: {}]   ;;  %s436_s2 = inlined_call_operand.hbm [shape: bf16[8,4,8], index: 2, kind: output, shape index: {0}]   ;;  %s437_s3 = inlined_call_operand.hbm [shape: f32[8,1,8], index: 3, kind: output, shape index: {1}]   ;;  %s438_s4 = inlined_call_operand.hbm [shape: f32[8,8], index: 4, kind: output, shape index: {2}]  }
   0x1   :  { %v25_v0 = vld [vmem:[%s435_s1 + $0x10] sm:$0xff]  ;;  %v26_v1 = vld [vmem:[%s435_s1 + $0x18] sm:$0xff]  ;;  %v23_v2 = vld [vmem:[%s435_s1] sm:$0xff] }
   0x2   :  { %v28_v3 = vpack.c.bf16 %v26_v1, %v25_v0  ;;  %v24_v4 = vld [vmem:[%s435_s1 + $0x8] sm:$0xff] }
   0x3   :  { %11 = vsyncpa [#allocation5], 0  ;;  %v27_v5 = vpack.c.bf16 %v24_v4, %v23_v2  ;;  %v259_v6 = vld [vmem:[%s434_s0 + $0x10] sm:$0xff]  ;;  %vm44_vm0 = vcmask 261120   ;;  %v257_v7 = vld [vmem:[%s434_s0] sm:$0xff]  ;;  %vm148_vm1 = vcmask 57344  }
   0x4   :  { %261 = vmatpush.bf16.msra.mxu2 %v28_v3  ;;  %60 = vmatpush.bf16.msra.mxu0 %v28_v3  ;;  %v258_v8 = vld [vmem:[%s434_s0 + $0x8] sm:$0xff]  ;;  %s210_s29 = sshll.u32 %s437_s3, 4  ;;  %s348_s30 = smov [#allocation4]   ;;  %vm90_vm2 = vcmask 1041408   ;;  %vm94_vm3 = vcmask 1043458   ;;  %vm124_vm4 = vcmask 58368   ;;  %s211_s29 = int_to_ptr.hbm [resolvable:$true] %s210_s29 }
   0x5   :  { %260 = vmatpush.bf16.msra.mxu1 %v28_v3  ;;  %s208_s5 = sshll.u32 %s348_s30, 4  ;;  %s349_s6 = smov 16   ;;  %vm189_vm5 = vcmask 64512   ;;  %s209_s5 = int_to_ptr.vmem [resolvable:$true] %s208_s5 }
   0x6   :  { %s350_s7 = smov 1   ;;  %s351_s3 = smov [#allocation2]  }
   0x7   :  { %s195_s8 = sshll.u32 %s351_s3, 4  ;;  %s197_s11 = sshll.u32 %s436_s2, 4  ;;  %s196_s8 = int_to_ptr.vmem [resolvable:$true] %s195_s8  ;;  %s198_s11 = int_to_ptr.hbm [resolvable:$true] %s197_s11 }
   0x8   :  { %263 = vmatpush.bf16.msra.mxu2 %v27_v5  ;;  %61 = vmatpush.bf16.msra.mxu0 %v27_v5  ;;  %s352_s2 = smov 32   ;;  %s353_s12 = smov 2  }
   0x9   :  { %262 = vmatpush.bf16.msra.mxu1 %v27_v5  ;;  %s354_s13 = smov [#allocation6]   ;;  %s224_s17 = sshll.u32 %s438_s4, 4  ;;  %s225_s17 = int_to_ptr.hbm [resolvable:$true] %s224_s17 }
   0xa   :  { %s222_s14 = sshll.u32 %s354_s13, 4  ;;  %s223_s14 = int_to_ptr.vmem [resolvable:$true] %s222_s14 }
   0xb   :  { %256 = vmatmul.msk.bf16.vlgmr.msra.gmra.mxu2 %vm44_vm0, %v259_v6  ;;  %254 = vmatmul.msk.bf16.vlgmr.msra.gmra.mxu0 %vm44_vm0, %v257_v7 }
   0xc   :  { %255 = vmatmul.msk.bf16.vlgmr.msra.gmra.mxu1 %vm44_vm0, %v258_v8 }
  0x88   :  { %v63_v18 = vpop.f32.mrf.mxu0 }
  0x89   :  { %v68_v19 = vpop.f32.mrf.mxu1  ;;  %v78_v20 = vpack.c.bf16 %v63_v18, %v63_v18 }
  0x8a   :  { %v80_v21 = vpack.c.bf16 %v68_v19, %v68_v19 }
  0x8b   :  { %v86_v22 = vrot.slane %v78_v20, 2 }
  0x8c   :  { %v88_v23 = vrot.slane %v80_v21, 2 }
  0x8d   :  { %v93_v24 = vsel %vm90_vm2, %v78_v20, %v86_v22  ;;  %v95_v25 = vsel %vm94_vm3, %v78_v20, %v86_v22 }
  0x8e   :  { %v73_v9 = vpop.f32.mrf.mxu2  ;;  %v106_v26 = vsel %vm90_vm2, %v80_v21, %v88_v23  ;;  %v107_v27 = vsel %vm94_vm3, %v80_v21, %v88_v23  ;;  %v97_v28 = vrot.slane %v95_v25, 2  ;;  %125 = vst.msk [vmem:[#allocation2] sm:$0x3] %vm124_vm4, %v93_v24 }
  0x8f   :  { %v134_v10 = vrot.slane %v73_v9, 1  ;;  %v135_v11 = vrot.slane %v73_v9, 2  ;;  %v136_v12 = vrot.slane %v73_v9, 3  ;;  %149 = vst.msk [vmem:[#allocation4] sm:$0x1] %vm148_vm1, %v73_v9  ;;  %v137_v13 = vrot.slane %v73_v9, 4 }
  0x90   :  { %v138_v14 = vrot.slane %v73_v9, 5  ;;  %v139_v15 = vrot.slane %v73_v9, 6  ;;  %v140_v16 = vrot.slane %v73_v9, 7  ;;  %v109_v29 = vrot.slane %v107_v27, 2  ;;  %129 = vst.msk [vmem:[#allocation2 + $0x8] sm:$0x3] %vm124_vm4, %v106_v26  ;;  %v65_v30 = vpop.f32.mrf.mxu0 }
  0x91   :  { %150 = vst.msk [vmem:[#allocation4 + $0x1] sm:$0x1] %vm148_vm1, %v134_v10  ;;  %v70_v31 = vpop.f32.mrf.mxu1  ;;  %v79_v32 = vpack.c.bf16 %v65_v30, %v65_v30 }
  0x92   :  { %151 = vst.msk [vmem:[#allocation4 + $0x2] sm:$0x1] %vm148_vm1, %v135_v11  ;;  %v81_v33 = vpack.c.bf16 %v70_v31, %v70_v31 }
  0x93   :  { %152 = vst.msk [vmem:[#allocation4 + $0x3] sm:$0x1] %vm148_vm1, %v136_v12  ;;  %v87_v34 = vrot.slane %v79_v32, 2 }
  0x94   :  { %153 = vst.msk [vmem:[#allocation4 + $0x4] sm:$0x1] %vm148_vm1, %v137_v13  ;;  %v89_v35 = vrot.slane %v81_v33, 2 }
  0x95   :  { %154 = vst.msk [vmem:[#allocation4 + $0x5] sm:$0x1] %vm148_vm1, %v138_v14  ;;  %v100_v36 = vsel %vm90_vm2, %v79_v32, %v87_v34  ;;  %v101_v37 = vsel %vm94_vm3, %v79_v32, %v87_v34 }
  0x96   :  { %155 = vst.msk [vmem:[#allocation4 + $0x6] sm:$0x1] %vm148_vm1, %v139_v15  ;;  %v75_v17 = vpop.f32.mrf.mxu2  ;;  %v112_v38 = vsel %vm90_vm2, %v81_v33, %v89_v35  ;;  %v113_v39 = vsel %vm94_vm3, %v81_v33, %v89_v35  ;;  %v103_v40 = vrot.slane %v101_v37, 2 }
  0x97   :  { %156 = vst.msk [vmem:[#allocation4 + $0x7] sm:$0x1] %vm148_vm1, %v140_v16  ;;  %157 = vxpose.xlu0.b32.start.end [1/1] (short) (narrow) %v75_v17, 8  ;;  %v115_v41 = vrot.slane %v113_v39, 2 }
  0x98   :  { %216 = dma.vmem_to_hbm [thread:$0]  %s209_s5, 128, %s211_s29, [#allocation5], %s349_s6, %s349_s6, %s350_s7   ;;  %126 = vst.msk [vmem:[#allocation2 + $0x2] sm:$0x3] %vm124_vm4, %v97_v28 }
  0x99   :  { %130 = vst.msk [vmem:[#allocation2 + $0xa] sm:$0x3] %vm124_vm4, %v109_v29 }
  0x9a   :  { %127 = vst.msk [vmem:[#allocation2 + $0x4] sm:$0x3] %vm124_vm4, %v100_v36 }
  0x9b   :  { %131 = vst.msk [vmem:[#allocation2 + $0xc] sm:$0x3] %vm124_vm4, %v112_v38 }
  0x9c   :  { %128 = vst.msk [vmem:[#allocation2 + $0x6] sm:$0x3] %vm124_vm4, %v103_v40 }
  0x9d   :  { %132 = vst.msk [vmem:[#allocation2 + $0xe] sm:$0x3] %vm124_vm4, %v115_v41 }
  0x9e   :  { %203 = dma.vmem_to_hbm [thread:$0]  %s196_s8, 256, %s198_s11, [#allocation3], %s352_s2, %s352_s2, %s353_s12  }
 0x13b   :  { %v173_v42 = vpop.trf.xlu0 }
 0x13c   :  { %190 = vst.msk [vmem:[#allocation6] sm:$0xff] %vm189_vm5, %v173_v42 }
 0x13d   :  { %227 = dma.vmem_to_hbm [thread:$0]  %s223_s14, 128, %s225_s17, [#allocation5]  }
 0x13e   :  { %344 = dma.done.wait [#allocation3], 256  }
 0x13f   :  { %345 = vsyncadd [#allocation3], 4294967040 }
 0x140   :  { %346 = dma.done.wait [#allocation5], 256  }
 0x141   :  { %347 = vsyncadd [#allocation5], 4294967040 }
 0x142   :  { %240 = vsyncpa [#allocation3], 1 }
 0x143   :  { %241 = vsyncpa [#allocation5], 1 }

</bundles_post_ra>
